<compile_context>
chip_gen: v5e
topology: v5e:2x2
jax: 0.10.0
libtpu: 0.0.40
codegen_flags: <defaults>
</compile_context>

<pallas_src>
import math

import jax
import jax.numpy as jnp
from jax.experimental import pallas as pl
from jax.experimental.pallas import tpu as pltpu


def _exp_decay_kernel(params_ref, x_ref, o_ref):
    # params_ref: SMEM (3,) -> [a + b, b, -c]   (host-folded constants)
    # x_ref / o_ref: VMEM tiles
    ab = params_ref[0]
    b = params_ref[1]
    neg_c = params_ref[2]
    x = x_ref[...]
    # a + b * (1 - exp(-x*c)) == (a + b) - b * exp(x * (-c))
    o_ref[...] = (ab - b * jnp.exp(x * neg_c)).astype(o_ref.dtype)


def _round_up(v, m):
    return ((v + m - 1) // m) * m


def _tile_config():
    """Per-generation row-tile cap + scoped VMEM limit for the streaming path."""
    vmem_bytes = None
    try:
        vmem_bytes = pltpu.get_tpu_info().vmem_capacity_bytes
    except Exception:
        vmem_bytes = None
    if vmem_bytes is None or vmem_bytes <= (64 << 20):
        # v7x-class (64 MiB physical VMEM) or unknown: cap at 4 MiB tiles.
        return 512, 48 << 20
    # v5e / v6e (128 MiB physical VMEM): allow 8 MiB tiles, raise scoped limit.
    return 1024, 96 << 20


_LANE_TILE = 2048          # lane-dense column width (large multiple of 128)
_SMALL_ELEMS = 256 * 1024  # <= 1 MiB f32 per array: single whole-array block


def _small_2d_view(x, total, orig_shape):
    """Pick a vreg-friendly (rows, width) view for the single-block path."""
    # Prefer a lane-dense width (multiple of 128) so stores are unmasked and
    # all 8 sublanes of each vreg are used; fall back to the natural collapse.
    for w in (2048, 1024, 512, 256, 128):
        if total % w == 0:
            return x.reshape(total // w, w)
    if x.ndim >= 2:
        return x.reshape(total // orig_shape[-1], orig_shape[-1])
    return x.reshape(1, total)


def exp_decay_forward(x, a, b, c):
    """a + b * (1 - exp(-x * c)) elementwise, arbitrary input shape."""
    orig_shape = x.shape
    dtype = x.dtype
    total = math.prod(orig_shape) if orig_shape else 1
    # Host-folded parameters: [a + b, b, -c].
    params = jnp.array([a + b, b, -c], dtype=jnp.float32)

    if total <= _SMALL_ELEMS:
        # Single block == whole array: no grid-step overhead, and no (8,128)
        # alignment constraint since block_shape equals the full array dims.
        x2d = _small_2d_view(x, total, orig_shape)
        out2d = pl.pallas_call(
            _exp_decay_kernel,
            out_shape=jax.ShapeDtypeStruct(x2d.shape, dtype),
            grid=(1,),
            in_specs=[
                pl.BlockSpec(memory_space=pltpu.SMEM),          # params (3,)
                pl.BlockSpec(x2d.shape, lambda i: (0, 0)),      # whole x
            ],
            out_specs=pl.BlockSpec(x2d.shape, lambda i: (0, 0)),
        )(params, x2d)
        return out2d.reshape(orig_shape)

    # Streaming path: flatten to a lane-dense (rows, 2048) slab, tile rows.
    tm_max, vmem_limit = _tile_config()
    tn = _LANE_TILE
    rows = -(-total // tn)
    # Aim for ~8 row blocks (pipeline depth + v7x megacore split), capped by
    # the per-generation VMEM budget; keep tm a multiple of 8.
    tm = min(tm_max, max(8, _round_up(-(-rows // 8), 8)))
    rows_pad = _round_up(rows, tm)
    pad = rows_pad * tn - total

    x_flat = x.reshape(-1)
    if pad:
        x_flat = jnp.pad(x_flat, (0, pad))
    x2d = x_flat.reshape(rows_pad, tn)

    out2d = pl.pallas_call(
        _exp_decay_kernel,
        out_shape=jax.ShapeDtypeStruct((rows_pad, tn), dtype),
        grid=(rows_pad // tm,),
        in_specs=[
            pl.BlockSpec(memory_space=pltpu.SMEM),              # params (3,)
            pl.BlockSpec((tm, tn), lambda i: (i, 0)),           # x row tile
        ],
        out_specs=pl.BlockSpec((tm, tn), lambda i: (i, 0)),
        compiler_params=pltpu.CompilerParams(
            dimension_semantics=("parallel",),
            vmem_limit_bytes=vmem_limit,
        ),
    )(params, x2d)

    out_flat = out2d.reshape(-1)
    if pad:
        out_flat = out_flat[:total]
    return out_flat.reshape(orig_shape)


def exp_decay_ref(x, a, b, c):
    return a + b * (1.0 - jnp.exp(-x * c))


if __name__ == "__main__":
    # Module defaults: a=-50.0, b=-2.0, c=20.0
    a, b, c = -50.0, -2.0, 20.0
    key = jax.random.PRNGKey(0)
    k1, k2, k3 = jax.random.split(key, 3)

    # Small input (single whole-array block path, lane-dense reshape).
    x_small = jax.random.uniform(
        k1, (2, 4, 16, 16), dtype=jnp.float32, minval=0.0, maxval=0.1)
    out_small = jax.block_until_ready(exp_decay_forward(x_small, a, b, c))
    ref_small = exp_decay_ref(x_small, a, b, c)
    assert out_small.shape == x_small.shape and out_small.dtype == x_small.dtype
    assert jnp.allclose(out_small, ref_small, rtol=1e-5, atol=1e-4), \
        "small-path mismatch vs reference"

    # Larger input (lane-dense streaming path, evenly divisible).
    x_big = jax.random.uniform(
        k2, (512, 2048), dtype=jnp.float32, minval=0.0, maxval=0.1)
    out_big = jax.block_until_ready(exp_decay_forward(x_big, a, b, c))
    ref_big = exp_decay_ref(x_big, a, b, c)
    assert out_big.shape == x_big.shape and out_big.dtype == x_big.dtype
    assert jnp.allclose(out_big, ref_big, rtol=1e-5, atol=1e-4), \
        "streaming-path mismatch vs reference"

    # Odd-sized input (streaming path with tail padding).
    x_odd = jax.random.uniform(
        k3, (300, 1000), dtype=jnp.float32, minval=0.0, maxval=0.1)
    out_odd = jax.block_until_ready(exp_decay_forward(x_odd, a, b, c))
    ref_odd = exp_decay_ref(x_odd, a, b, c)
    assert out_odd.shape == x_odd.shape and out_odd.dtype == x_odd.dtype
    assert jnp.allclose(out_odd, ref_odd, rtol=1e-5, atol=1e-4), \
        "padded-path mismatch vs reference"

    print("KERNEL_OK")
</pallas_src>

<mosaic_0001>
module attributes {stable_mosaic.version = 11 : i64} {
  func.func @_exp_decay_kernel(%arg0: i32, %arg1: memref<3xf32, #tpu.memory_space<smem>>, %arg2: memref<1x2048xf32, #tpu.memory_space<vmem>>, %arg3: memref<1x2048xf32, #tpu.memory_space<vmem>>) attributes {dimension_semantics = [#tpu.dimension_semantics<arbitrary>], iteration_bounds = array<i64: 1>, scalar_prefetch = 0 : i64, scratch_operands = 0 : i64, tpu.core_type = #tpu.core_type<tc>, window_params = [{transform_indices = @transform_0, window_bounds = array<i64: 3>}, {pipeline_mode = #tpu.pipeline_mode<synchronous>, transform_indices = @transform_1, window_bounds = array<i64: 1, 2048>}, {pipeline_mode = #tpu.pipeline_mode<synchronous>, transform_indices = @transform_2, window_bounds = array<i64: 1, 2048>}]} {
    %c0 = arith.constant 0 : index
    %0 = memref.load %arg1[%c0] : memref<3xf32, #tpu.memory_space<smem>>
    %c1 = arith.constant 1 : index
    %1 = memref.load %arg1[%c1] : memref<3xf32, #tpu.memory_space<smem>>
    %c2 = arith.constant 2 : index
    %2 = memref.load %arg1[%c2] : memref<3xf32, #tpu.memory_space<smem>>
    %c0_0 = arith.constant 0 : index
    %c0_1 = arith.constant 0 : index
    %3 = vector.load %arg2[%c0_0, %c0_1] : memref<1x2048xf32, #tpu.memory_space<vmem>>, vector<1x2048xf32>
    %4 = vector.broadcast %2 : f32 to vector<1x2048xf32>
    %5 = arith.mulf %3, %4 : vector<1x2048xf32>
    %6 = math.exp %5 : vector<1x2048xf32>
    %7 = vector.broadcast %1 : f32 to vector<1x2048xf32>
    %8 = arith.mulf %7, %6 : vector<1x2048xf32>
    %9 = vector.broadcast %0 : f32 to vector<1x2048xf32>
    %10 = arith.subf %9, %8 : vector<1x2048xf32>
    %c0_2 = arith.constant 0 : index
    %c0_3 = arith.constant 0 : index
    %11 = vector.load %arg3[%c0_2, %c0_3] : memref<1x2048xf32, #tpu.memory_space<vmem>>, vector<1x2048xf32>
    tpu.vector_store %arg3[%c0_2, %c0_3], %10 {strides = array<i32>} : memref<1x2048xf32, #tpu.memory_space<vmem>>, vector<1x2048xf32>,
    return
  }
  func.func @transform_0(%arg0: i32) -> i32 {
    %c0_i32 = arith.constant 0 : i32
    %c0_i32_0 = arith.constant 0 : i32
    return %c0_i32 : i32
  }
  func.func @transform_1(%arg0: i32) -> (i32, i32) {
    %c0_i32 = arith.constant 0 : i32
    %c0_i32_0 = arith.constant 0 : i32
    %c0_i32_1 = arith.constant 0 : i32
    return %c0_i32, %c0_i32_0 : i32, i32
  }
  func.func @transform_2(%arg0: i32) -> (i32, i32) {
    %c0_i32 = arith.constant 0 : i32
    %c0_i32_0 = arith.constant 0 : i32
    %c0_i32_1 = arith.constant 0 : i32
    return %c0_i32, %c0_i32_0 : i32, i32
  }
}

</mosaic_0001>

<bundles_post_ra>
// kernel: tpu_custom_call.1
= control target key start
LH: loop header
LB: loop body
LE: loop exit
PB: predicated region body
PF: predicated region fallthrough
CT: control target
= control target key end

     0   :  { %7 = vsyncpa [#allocation5], 0  ;;  %s179_s0 = inlined_call_operand.hbm [shape: f32[3], index: 0, kind: input, shape index: {}]   ;;  %s180_s1 = inlined_call_operand.hbm [shape: f32[1,2048], index: 1, kind: input, shape index: {}]   ;;  %s181_s2 = inlined_call_operand.hbm [shape: f32[1,2048], index: 2, kind: output, shape index: {}]  }
   0x1   :  { %8 = vsyncpa [#allocation3], 0 }
   0x2   :  { %9 = vsyncpa [#allocation4], 0  ;;  %s15_s11 = sshll.u32 %s179_s0, 4  ;;  %s24_s14 = sshll.u32 %s180_s1, 4  ;;  %s16_s11 = int_to_ptr.hbm [resolvable:$true] %s15_s11  ;;  %s25_s14 = int_to_ptr.hbm [resolvable:$true] %s24_s14 }
   0x3   :  { %s152_s15 = smov [#allocation2]   ;;  %s153_s16 = smov [#allocation6]  }
   0x4   :  { %18 = dma.hbm_to_smem %s16_s11, 16, %s152_s15, [#allocation5]  }
   0x5   :  { %s26_s17 = sshll.u32 %s153_s16, 4  ;;  %s27_s17 = int_to_ptr.vmem [resolvable:$true] %s26_s17 }
   0x6   :  { %29 = dma.hbm_to_vmem [thread:$0]  %s25_s14, 256, %s27_s17, [#allocation3]  }
   0x7   :  { %146 = dma.done.wait [#allocation5], 16  }
   0x8   :  { %147 = vsyncadd [#allocation5], 4294967280 }
   0x9   :  { %148 = dma.done.wait [#allocation3], 256  }
   0xa   :  { %149 = vsyncadd [#allocation3], 4294967040 }
   0xb   :  { %38 = sfence }
   0xc   :  { %s78_s18 = sld [smem:[#allocation2 + $0x2]]  ;;  %v42_v0 = vld [vmem:[#allocation6] sm:$0xff]  ;;  %v43_v1 = vld [vmem:[#allocation6 + $0x8] sm:$0xff]  ;;  %s154_s19 = smov [#allocation7]  }
   0xd   :  { %s77_s0 = sld [smem:[#allocation2 + $0x1]]  ;;  %s64_s20 = sshll.u32 %s154_s19, 4  ;;  %s65_s20 = int_to_ptr.vmem [resolvable:$true] %s64_s20 }
   0xe   :  { %s39_s1 = sld [smem:[#allocation2]]  ;;  %s66_s23 = sshll.u32 %s181_s2, 4  ;;  %s67_s23 = int_to_ptr.hbm [resolvable:$true] %s66_s23 }
  0x12   :  { %v44_v2 = vstv %s78_s18 }
  0x13   :  { %v45_v3 = vmul.f32 %v44_v2, %v42_v0  ;;  %v46_v4 = vmul.f32 %v44_v2, %v43_v1  ;;  %v51_v7 = vstv %s77_s0 }
  0x14   :  { %v54_v9 = vstv %s39_s1 }
  0x15   :  { %v47_v5 = vmul.f32 1.442695, %v45_v3  ;;  %v49_v6 = vmul.f32 1.442695, %v46_v4 }
  0x17   :  { %82 = vpow2.f32 %v47_v5 }
  0x18   :  { %84 = vpow2.f32 %v49_v6 }
  0x1d   :  { %v83_v8 = vpop.eup %82 }
  0x1e   :  { %v85_v10 = vpop.eup %84  ;;  %v52_v11 = vmul.f32 %v83_v8, %v51_v7 }
  0x1f   :  { %v53_v12 = vmul.f32 %v85_v10, %v51_v7 }
  0x20   :  { %v55_v13 = vsub.f32 %v54_v9, %v52_v11 }
  0x21   :  { %v56_v14 = vsub.f32 %v54_v9, %v53_v12 }
  0x22   :  { %57 = vst [vmem:[#allocation7] sm:$0xff] %v55_v13 }
  0x23   :  { %58 = vst [vmem:[#allocation7 + $0x8] sm:$0xff] %v56_v14 }
  0x24   :  { %69 = dma.vmem_to_hbm [thread:$0]  %s65_s20, 256, %s67_s23, [#allocation4]  }
  0x25   :  { %150 = dma.done.wait [#allocation4], 256  }
  0x26   :  { %151 = vsyncadd [#allocation4], 4294967040 }
  0x27   :  { %74 = vsyncpa [#allocation3], 1 }
  0x28   :  { %75 = vsyncpa [#allocation4], 1 }
  0x29   :  { %76 = vsyncpa [#allocation5], 1 }

</bundles_post_ra>
